<compile_context>
chip_gen: v7x
topology: tpu7x:2x2x1
jax: 0.10.0
libtpu: 0.0.40
codegen_flags: <defaults>
</compile_context>

<pallas_src>
import jax
import jax.numpy as jnp
from jax.experimental import pallas as pl
from jax.experimental.pallas import tpu as pltpu


def _round_up(a: int, b: int) -> int:
    return ((a + b - 1) // b) * b


def _vmem_capacity_bytes() -> int:
    """Physical VMEM per TensorCore; conservative fallback = v7x (64 MiB)."""
    try:
        cap = getattr(pltpu.get_tpu_info(), "vmem_capacity_bytes", None)
        if cap:
            return int(cap)
    except Exception:
        pass
    return 64 * 1024 * 1024


def _glu_kernel(x_ref, w1_ref, w2_ref, b1_ref, b2_ref, o_ref, acc_a, acc_b):
    """x:(tm,tk)  w1/w2:(tk,tn)  b1/b2:(1,tn)  o:(tm,tn)  acc_a/acc_b:(tm,tn) f32."""
    k = pl.program_id(2)

    @pl.when(k == 0)
    def _():
        # Fold the biases into the accumulator init — saves an epilogue add.
        acc_a[...] = jnp.broadcast_to(b1_ref[...].astype(jnp.float32), acc_a.shape)
        acc_b[...] = jnp.broadcast_to(b2_ref[...].astype(jnp.float32), acc_b.shape)

    x = x_ref[...]
    acc_a[...] += jnp.dot(x, w1_ref[...], preferred_element_type=jnp.float32)
    acc_b[...] += jnp.dot(x, w2_ref[...], preferred_element_type=jnp.float32)

    @pl.when(k == pl.num_programs(2) - 1)
    def _():
        # sigmoid(b) = 1 / (1 + exp(-b)); exp + approx reciprocal both use the
        # EUP slot, keeping the epilogue off the VALU/vld critical path.
        gate = pl.reciprocal(1.0 + jnp.exp(-acc_b[...]), approx=True)
        o_ref[...] = (acc_a[...] * gate).astype(o_ref.dtype)


def glu_pallas(x, w1, b1, w2, b2, *, tile_m=512, tile_n=512, tile_k=1024,
               use_bf16_mxu=True):
    """GLU forward: fc1(x) * sigmoid(fc2(x)).

    x      : [..., input_size]
    w1, w2 : (input_size, output_size)   (nn.Linear weight, pre-transposed)
    b1, b2 : (output_size,)
    """
    orig_shape = x.shape
    K = orig_shape[-1]
    N = w1.shape[1]
    x2d = x.reshape(-1, K)
    M = x2d.shape[0]

    mxu_dtype = jnp.bfloat16 if use_bf16_mxu else x.dtype
    in_bytes = jnp.dtype(mxu_dtype).itemsize
    out_bytes = jnp.dtype(x.dtype).itemsize
    row_align = 8 if in_bytes == 4 else 16          # f32 sublane=8, bf16=16

    # ---- tile sizing (lane-dense, dtype-aware, no divisibility asserts) ----
    tile_k = min(_round_up(tile_k, 128), _round_up(K, 128))
    tile_n = min(_round_up(tile_n, 128), _round_up(N, 128))
    tile_m = min(_round_up(tile_m, row_align), _round_up(M, row_align))

    # ---- generation-aware VMEM budget (leave headroom for compiler scratch) ----
    vmem_budget = int(0.80 * _vmem_capacity_bytes())   # ~51 MiB v7x, ~102 MiB v5e/v6e

    def vmem_est(tm, tn, tk):
        return (2 * tm * tk * in_bytes            # x   (double buffered)
                + 2 * 2 * tk * tn * in_bytes      # w1 + w2
                + 2 * 2 * tn * 4                  # biases (f32, tiny)
                + 2 * tm * tn * out_bytes         # output
                + 2 * tm * tn * 4)                # two f32 accumulators

    while vmem_est(tile_m, tile_n, tile_k) > vmem_budget:
        if tile_k > 512:
            tile_k = max(512, _round_up(tile_k // 2, 128))
        elif tile_n > 256:
            tile_n = max(256, _round_up(tile_n // 2, 128))
        elif tile_m > 2 * row_align:
            tile_m = max(row_align, _round_up(tile_m // 2, row_align))
        else:
            break

    Kp = _round_up(K, tile_k)
    Np = _round_up(N, tile_n)
    Mp = _round_up(M, tile_m)

    # ---- operand prep: pad to tile multiples, cast MXU operands to bf16 ----
    # TODO(synk): in a real model, pad/cast the weights once at init time
    # rather than per call; here the pads are cheap one-offs for demo shapes.
    x_p = x2d if (Mp == M and Kp == K) else jnp.pad(x2d, ((0, Mp - M), (0, Kp - K)))
    w1_p = w1 if (Kp == K and Np == N) else jnp.pad(w1, ((0, Kp - K), (0, Np - N)))
    w2_p = w2 if (Kp == K and Np == N) else jnp.pad(w2, ((0, Kp - K), (0, Np - N)))
    x_p = x_p.astype(mxu_dtype)
    w1_p = w1_p.astype(mxu_dtype)
    w2_p = w2_p.astype(mxu_dtype)
    b1_p = jnp.pad(b1, (0, Np - N)).reshape(1, Np).astype(jnp.float32)
    b2_p = jnp.pad(b2, (0, Np - N)).reshape(1, Np).astype(jnp.float32)

    # N outermost, M middle, K innermost: when Kp == tile_k the weight block
    # index never changes across the M loop -> weights stay resident in VMEM.
    grid = (Np // tile_n, Mp // tile_m, Kp // tile_k)

    out_pad = pl.pallas_call(
        _glu_kernel,
        out_shape=jax.ShapeDtypeStruct((Mp, Np), x.dtype),
        grid_spec=pltpu.PrefetchScalarGridSpec(
            num_scalar_prefetch=0,
            grid=grid,
            in_specs=[
                pl.BlockSpec((tile_m, tile_k), lambda n, i, k: (i, k)),  # x
                pl.BlockSpec((tile_k, tile_n), lambda n, i, k: (k, n)),  # W1
                pl.BlockSpec((tile_k, tile_n), lambda n, i, k: (k, n)),  # W2
                pl.BlockSpec((1, tile_n), lambda n, i, k: (0, n)),       # b1
                pl.BlockSpec((1, tile_n), lambda n, i, k: (0, n)),       # b2
            ],
            out_specs=pl.BlockSpec((tile_m, tile_n), lambda n, i, k: (i, n)),
            scratch_shapes=[pltpu.VMEM((tile_m, tile_n), jnp.float32),
                            pltpu.VMEM((tile_m, tile_n), jnp.float32)],
        ),
        compiler_params=pltpu.CompilerParams(
            dimension_semantics=("parallel", "parallel", "arbitrary"),
            vmem_limit_bytes=vmem_budget,
        ),
    )(x_p, w1_p, w2_p, b1_p, b2_p)

    out = out_pad[:M, :N]
    return out.reshape(*orig_shape[:-1], N)


if __name__ == "__main__":
    key = jax.random.PRNGKey(0)
    batch, seq, input_size, output_size = 2, 8, 32, 32

    k_x, k_w1, k_b1, k_w2, k_b2 = jax.random.split(key, 5)
    x = jax.random.normal(k_x, (batch, seq, input_size), dtype=jnp.float32)

    # Deterministic init mimicking nn.Linear's uniform(-1/sqrt(in), 1/sqrt(in)).
    bound = 1.0 / (input_size ** 0.5)
    w1 = jax.random.uniform(k_w1, (input_size, output_size), jnp.float32, -bound, bound)
    b1 = jax.random.uniform(k_b1, (output_size,), jnp.float32, -bound, bound)
    w2 = jax.random.uniform(k_w2, (input_size, output_size), jnp.float32, -bound, bound)
    b2 = jax.random.uniform(k_b2, (output_size,), jnp.float32, -bound, bound)

    ref = (x @ w1 + b1) * jax.nn.sigmoid(x @ w2 + b2)

    # Default path: bf16 MXU operands, f32 accumulation.
    out = jax.block_until_ready(glu_pallas(x, w1, b1, w2, b2))
    assert out.shape == (batch, seq, output_size)
    assert jnp.allclose(out, ref, atol=2e-2, rtol=2e-2), "bf16 path mismatch"

    # Full-precision operand path (checks tiling/indexing at tighter tolerance).
    out_f32 = jax.block_until_ready(glu_pallas(x, w1, b1, w2, b2, use_bf16_mxu=False))
    assert jnp.allclose(out_f32, ref, atol=5e-3, rtol=5e-3), "f32 path mismatch"

    print("KERNEL_OK")
</pallas_src>

<mosaic_0001>
module attributes {stable_mosaic.version = 11 : i64} {
  func.func @_glu_kernel(%arg0: i32, %arg1: i32, %arg2: i32, %arg3: memref<16x128xbf16, #tpu.memory_space<vmem>>, %arg4: memref<128x128xbf16, #tpu.memory_space<vmem>>, %arg5: memref<128x128xbf16, #tpu.memory_space<vmem>>, %arg6: memref<1x128xf32, #tpu.memory_space<vmem>>, %arg7: memref<1x128xf32, #tpu.memory_space<vmem>>, %arg8: memref<16x128xf32, #tpu.memory_space<vmem>>, %arg9: memref<16x128xf32, #tpu.memory_space<vmem>>, %arg10: memref<16x128xf32, #tpu.memory_space<vmem>>) attributes {dimension_semantics = [#tpu.dimension_semantics<parallel>, #tpu.dimension_semantics<parallel>, #tpu.dimension_semantics<arbitrary>], iteration_bounds = array<i64: 1, 1, 1>, scalar_prefetch = 0 : i64, scratch_operands = 2 : i64, tpu.core_type = #tpu.core_type<tc>, window_params = [{transform_indices = @transform_0, window_bounds = array<i64: 16, 128>}, {transform_indices = @transform_1, window_bounds = array<i64: 128, 128>}, {transform_indices = @transform_2, window_bounds = array<i64: 128, 128>}, {transform_indices = @transform_3, window_bounds = array<i64: 1, 128>}, {transform_indices = @transform_4, window_bounds = array<i64: 1, 128>}, {transform_indices = @transform_5, window_bounds = array<i64: 16, 128>}]} {
    %c0_i32 = arith.constant 0 : i32
    %0 = arith.cmpi eq, %arg2, %c0_i32 : i32
    %1 = arith.extui %0 : i1 to i32
    %c0_i32_0 = arith.constant 0 : i32
    %2 = arith.cmpi ne, %1, %c0_i32_0 : i32
    scf.if %2 {
      %c0_17 = arith.constant 0 : index
      %c0_18 = arith.constant 0 : index
      %17 = vector.load %arg6[%c0_17, %c0_18] : memref<1x128xf32, #tpu.memory_space<vmem>>, vector<1x128xf32>
      %18 = vector.shape_cast %17 : vector<1x128xf32> to vector<1x128xf32>
      %19 = vector.broadcast %18 : vector<1x128xf32> to vector<16x128xf32>
      %c0_19 = arith.constant 0 : index
      %c0_20 = arith.constant 0 : index
      %20 = vector.load %arg9[%c0_19, %c0_20] : memref<16x128xf32, #tpu.memory_space<vmem>>, vector<16x128xf32>
      tpu.vector_store %arg9[%c0_19, %c0_20], %19 {strides = array<i32>} : memref<16x128xf32, #tpu.memory_space<vmem>>, vector<16x128xf32>,
      %c0_21 = arith.constant 0 : index
      %c0_22 = arith.constant 0 : index
      %21 = vector.load %arg7[%c0_21, %c0_22] : memref<1x128xf32, #tpu.memory_space<vmem>>, vector<1x128xf32>
      %22 = vector.shape_cast %21 : vector<1x128xf32> to vector<1x128xf32>
      %23 = vector.broadcast %22 : vector<1x128xf32> to vector<16x128xf32>
      %c0_23 = arith.constant 0 : index
      %c0_24 = arith.constant 0 : index
      %24 = vector.load %arg10[%c0_23, %c0_24] : memref<16x128xf32, #tpu.memory_space<vmem>>, vector<16x128xf32>
      tpu.vector_store %arg10[%c0_23, %c0_24], %23 {strides = array<i32>} : memref<16x128xf32, #tpu.memory_space<vmem>>, vector<16x128xf32>,
    } else {
    }
    %c0 = arith.constant 0 : index
    %c0_1 = arith.constant 0 : index
    %3 = vector.load %arg3[%c0, %c0_1] : memref<16x128xbf16, #tpu.memory_space<vmem>>, vector<16x128xbf16>
    %c0_2 = arith.constant 0 : index
    %c0_3 = arith.constant 0 : index
    %4 = vector.load %arg9[%c0_2, %c0_3] : memref<16x128xf32, #tpu.memory_space<vmem>>, vector<16x128xf32>
    %c0_4 = arith.constant 0 : index
    %c0_5 = arith.constant 0 : index
    %5 = vector.load %arg4[%c0_4, %c0_5] : memref<128x128xbf16, #tpu.memory_space<vmem>>, vector<128x128xbf16>
    %cst = arith.constant dense<0.000000e+00> : vector<16x128xf32>
    %6 = tpu.matmul %3, %5, %cst {dimension_numbers = #tpu.dot_dimension_numbers<[1], [0], [0], [1], [0, 0, 1, 1], [], []>} : vector<16x128xbf16>, vector<128x128xbf16>, vector<16x128xf32> -> vector<16x128xf32>
    %7 = arith.addf %4, %6 : vector<16x128xf32>
    %c0_6 = arith.constant 0 : index
    %c0_7 = arith.constant 0 : index
    %8 = vector.load %arg9[%c0_6, %c0_7] : memref<16x128xf32, #tpu.memory_space<vmem>>, vector<16x128xf32>
    tpu.vector_store %arg9[%c0_6, %c0_7], %7 {strides = array<i32>} : memref<16x128xf32, #tpu.memory_space<vmem>>, vector<16x128xf32>,
    %c0_8 = arith.constant 0 : index
    %c0_9 = arith.constant 0 : index
    %9 = vector.load %arg10[%c0_8, %c0_9] : memref<16x128xf32, #tpu.memory_space<vmem>>, vector<16x128xf32>
    %c0_10 = arith.constant 0 : index
    %c0_11 = arith.constant 0 : index
    %10 = vector.load %arg5[%c0_10, %c0_11] : memref<128x128xbf16, #tpu.memory_space<vmem>>, vector<128x128xbf16>
    %cst_12 = arith.constant dense<0.000000e+00> : vector<16x128xf32>
    %11 = tpu.matmul %3, %10, %cst_12 {dimension_numbers = #tpu.dot_dimension_numbers<[1], [0], [0], [1], [0, 0, 1, 1], [], []>} : vector<16x128xbf16>, vector<128x128xbf16>, vector<16x128xf32> -> vector<16x128xf32>
    %12 = arith.addf %9, %11 : vector<16x128xf32>
    %c0_13 = arith.constant 0 : index
    %c0_14 = arith.constant 0 : index
    %13 = vector.load %arg10[%c0_13, %c0_14] : memref<16x128xf32, #tpu.memory_space<vmem>>, vector<16x128xf32>
    tpu.vector_store %arg10[%c0_13, %c0_14], %12 {strides = array<i32>} : memref<16x128xf32, #tpu.memory_space<vmem>>, vector<16x128xf32>,
    %c0_i32_15 = arith.constant 0 : i32
    %14 = arith.cmpi eq, %arg2, %c0_i32_15 : i32
    %15 = arith.extui %14 : i1 to i32
    %c0_i32_16 = arith.constant 0 : i32
    %16 = arith.cmpi ne, %15, %c0_i32_16 : i32
    scf.if %16 {
      %c0_17 = arith.constant 0 : index
      %c0_18 = arith.constant 0 : index
      %17 = vector.load %arg10[%c0_17, %c0_18] : memref<16x128xf32, #tpu.memory_space<vmem>>, vector<16x128xf32>
      %cst_19 = arith.constant 0.000000e+00 : f32
      %18 = vector.broadcast %cst_19 : f32 to vector<16x128xf32>
      %19 = arith.subf %18, %17 : vector<16x128xf32>
      %20 = math.exp %19 : vector<16x128xf32>
      %cst_20 = arith.constant 1.000000e+00 : f32
      %21 = vector.broadcast %cst_20 : f32 to vector<16x128xf32>
      %22 = arith.addf %21, %20 : vector<16x128xf32>
      %23 = tpu.reciprocal %22 {approx = true} : vector<16x128xf32> -> vector<16x128xf32>
      %c0_21 = arith.constant 0 : index
      %c0_22 = arith.constant 0 : index
      %24 = vector.load %arg9[%c0_21, %c0_22] : memref<16x128xf32, #tpu.memory_space<vmem>>, vector<16x128xf32>
      %25 = arith.mulf %24, %23 : vector<16x128xf32>
      %c0_23 = arith.constant 0 : index
      %c0_24 = arith.constant 0 : index
      %26 = vector.load %arg8[%c0_23, %c0_24] : memref<16x128xf32, #tpu.memory_space<vmem>>, vector<16x128xf32>
      tpu.vector_store %arg8[%c0_23, %c0_24], %25 {strides = array<i32>} : memref<16x128xf32, #tpu.memory_space<vmem>>, vector<16x128xf32>,
    } else {
    }
    return
  }
  func.func @transform_0(%arg0: i32, %arg1: i32, %arg2: i32) -> (i32, i32) {
    %c0_i32 = arith.constant 0 : i32
    return %arg1, %arg2 : i32, i32
  }
  func.func @transform_1(%arg0: i32, %arg1: i32, %arg2: i32) -> (i32, i32) {
    %c0_i32 = arith.constant 0 : i32
    return %arg2, %arg0 : i32, i32
  }
  func.func @transform_2(%arg0: i32, %arg1: i32, %arg2: i32) -> (i32, i32) {
    %c0_i32 = arith.constant 0 : i32
    return %arg2, %arg0 : i32, i32
  }
  func.func @transform_3(%arg0: i32, %arg1: i32, %arg2: i32) -> (i32, i32) {
    %c0_i32 = arith.constant 0 : i32
    %c0_i32_0 = arith.constant 0 : i32
    return %c0_i32, %arg0 : i32, i32
  }
  func.func @transform_4(%arg0: i32, %arg1: i32, %arg2: i32) -> (i32, i32) {
    %c0_i32 = arith.constant 0 : i32
    %c0_i32_0 = arith.constant 0 : i32
    return %c0_i32, %arg0 : i32, i32
  }
  func.func @transform_5(%arg0: i32, %arg1: i32, %arg2: i32) -> (i32, i32) {
    %c0_i32 = arith.constant 0 : i32
    return %arg1, %arg0 : i32, i32
  }
}

</mosaic_0001>

<bundles_post_ra>
// kernel: tpu_custom_call.1
= control target key start
LH: loop header
LB: loop body
LE: loop exit
PB: predicated region body
PF: predicated region fallthrough
CT: control target
= control target key end

     0   :  { %10 = vsyncpa [#allocation5], 0  ;;  %s670_s0 = inlined_call_operand.hbm [shape: bf16[16,128], index: 0, kind: input, shape index: {}]   ;;  %s671_s1 = inlined_call_operand.hbm [shape: bf16[128,128], index: 1, kind: input, shape index: {}]   ;;  %s672_s2 = inlined_call_operand.hbm [shape: bf16[128,128], index: 2, kind: input, shape index: {}]   ;;  %s673_s3 = inlined_call_operand.vmem [shape: f32[1,128], index: 3, kind: input, shape index: {}]   ;;  %s674_s4 = inlined_call_operand.vmem [shape: f32[1,128], index: 4, kind: input, shape index: {}]   ;;  %s675_s5 = inlined_call_operand.hbm [shape: f32[16,128], index: 5, kind: output, shape index: {}]  }
   0x1   :  { %11 = vsyncpa [#allocation8], 0 }
   0x2   :  { %12 = vsyncpa [#allocation6], 0  ;;  %s560_s18 = smov [#allocation7]   ;;  %s561_s20 = smov [#allocation4]  }
   0x3   :  { %s30_s19 = sshll.u32 %s560_s18, 4  ;;  %s18_s21 = sshll.u32 %s561_s20, 4  ;;  %s31_s19 = int_to_ptr.vmem [resolvable:$true] %s30_s19  ;;  %s600_s21 = int_to_ptr.vmem [resolvable:$true] %s18_s21 }
   0x4   :  { %s466_s24 = scalar_lea.hbm %s671_s1, 1024 }
   0x5   :  { %p467_p0 = scmp.ne.s32.totalorder %s671_s1, %s466_s24  ;;  %p470_p1 = scmp.lt.u32.totalorder %s466_s24, %s671_s1 }
   0x7   :  { %p472_p2 = pnand %p470_p1, %p467_p0 }
   0x9   :  { %475 = shalt.err (!%p472_p2)
}
   0xa   :  { %s476_s29 = scalar_lea.vmem %s31_s19, 1024  ;;  %p481_p4 = scmp.lt.s32.totalorder %s31_s19, %s31_s19 }
   0xb   :  { %p477_p3 = scmp.ne.s32.totalorder %s31_s19, %s476_s29  ;;  %p482_p5 = scmp.lt.s32.totalorder %s476_s29, %s476_s29 }
   0xd   :  { %p483_p6 = por %p482_p5, %p481_p4 }
   0xf   :  { %p484_p7 = pnand %p483_p6, %p477_p3 }
  0x11   :  { %487 = shalt.err (!%p484_p7)
}
  0x12   :  { %s562_s30 = smov 64   ;;  %s563_s6 = smov 4  }
  0x13   :  { %36 = dma.hbm_to_vmem [thread:$0]  %s671_s1, 1024, %s31_s19, [#allocation8], %s562_s30, %s562_s30, %s563_s6  }
  0x14   :  { %s488_s11 = scalar_lea.hbm %s670_s0, 128 }
  0x15   :  { %p489_p8 = scmp.ne.s32.totalorder %s670_s0, %s488_s11  ;;  %p492_p9 = scmp.lt.u32.totalorder %s488_s11, %s670_s0 }
  0x17   :  { %p494_p10 = pnand %p492_p9, %p489_p8 }
  0x19   :  { %497 = shalt.err (!%p494_p10)
}
  0x1a   :  { %s498_s16 = scalar_lea.vmem %s600_s21, 128  ;;  %p503_p12 = scmp.lt.s32.totalorder %s600_s21, %s600_s21 }
  0x1b   :  { %p499_p11 = scmp.ne.s32.totalorder %s600_s21, %s498_s16  ;;  %p504_p13 = scmp.lt.s32.totalorder %s498_s16, %s498_s16 }
  0x1d   :  { %p505_p0 = por %p504_p13, %p503_p12 }
  0x1f   :  { %p506_p1 = pnand %p505_p0, %p499_p11 }
  0x21   :  { %509 = shalt.err (!%p506_p1)
}
  0x22   :  { %24 = dma.hbm_to_vmem [thread:$0]  %s670_s0, 128, %s600_s21, [#allocation5], %s562_s30, %s562_s30, %s563_s6  }
  0x23   :  { %s564_s18 = smov [#allocation9]   ;;  %s510_s23 = scalar_lea.hbm %s672_s2, 1024 }
  0x24   :  { %s42_s19 = sshll.u32 %s564_s18, 4  ;;  %p511_p2 = scmp.ne.s32.totalorder %s672_s2, %s510_s23  ;;  %s43_s19 = int_to_ptr.vmem [resolvable:$true] %s42_s19 }
  0x25   :  { %p514_p3 = scmp.lt.u32.totalorder %s510_s23, %s672_s2 }
  0x27   :  { %p516_p4 = pnand %p514_p3, %p511_p2 }
  0x29   :  { %519 = shalt.err (!%p516_p4)
}
  0x2a   :  { %s520_s28 = scalar_lea.vmem %s43_s19, 1024  ;;  %p525_p6 = scmp.lt.s32.totalorder %s43_s19, %s43_s19 }
  0x2b   :  { %p521_p5 = scmp.ne.s32.totalorder %s43_s19, %s520_s28  ;;  %p526_p7 = scmp.lt.s32.totalorder %s520_s28, %s520_s28 }
  0x2d   :  { %p527_p8 = por %p526_p7, %p525_p6 }
  0x2f   :  { %p528_p9 = pnand %p527_p8, %p521_p5 }
  0x31   :  { %531 = shalt.err (!%p528_p9)
}
  0x32   :  { %48 = dma.hbm_to_vmem [thread:$0]  %s672_s2, 1024, %s43_s19, [#allocation8], %s562_s30, %s562_s30, %s563_s6  }
  0x33   :  { %554 = dma.done.wait [#allocation5], 128  }
  0x34   :  { %555 = vsyncadd [#allocation5], 4294967168 }
  0x35   :  { %556 = dma.done.wait [#allocation8], 2048  }
  0x36   :  { %557 = vsyncadd [#allocation8], 4294965248  ;;  %v565_v0 = vmov 0.0   ;;  %vm566_vm0 = vmmov 0   ;;  %v441_v1 = vld [vmem:[#allocation9] sm:$0xff]   ;;  %v442_v2 = vld [vmem:[#allocation9 + $0x8] sm:$0xff]  }
  0x37   :  { %411 = vmatprep.subr.bf16.mxu1 %v565_v0  ;;  %391 = vmatprep.subr.bf16.mxu0 %v565_v0  ;;  %v443_v3 = vld [vmem:[#allocation9 + $0x10] sm:$0xff]   ;;  %v448_v4 = vld [vmem:[#allocation7] sm:$0xff]   ;;  %v450_v5 = vld [vmem:[#allocation7 + $0x8] sm:$0xff]   ;;  %s567_s6 = smov [#allocation10]  }
  0x38   :  { %427 = vmatprep.mubr.msk.bf16.mxu1 %vm566_vm0, %v565_v0  ;;  %407 = vmatprep.mubr.msk.bf16.mxu0 %vm566_vm0, %v565_v0  ;;  %v444_v6 = vld [vmem:[#allocation9 + $0x18] sm:$0xff]   ;;  %v452_v7 = vld [vmem:[#allocation7 + $0x10] sm:$0xff]   ;;  %v445_v8 = vld [vmem:[#allocation9 + $0x20] sm:$0xff]   ;;  %s341_s7 = sshll.u32 %s567_s6, 4  ;;  %s342_s7 = int_to_ptr.vmem [resolvable:$true] %s341_s7 }
  0x39   :  { %412 = vmatpush3.bf16.msra.mxu1 %v441_v1  ;;  %392 = vmatpush3.bf16.msra.mxu0 %v448_v4  ;;  %v453_v9 = vld [vmem:[#allocation7 + $0x18] sm:$0xff]   ;;  %v446_v10 = vld [vmem:[#allocation9 + $0x28] sm:$0xff]   ;;  %v454_v11 = vld [vmem:[#allocation7 + $0x20] sm:$0xff]   ;;  %s532_s8 = scalar_lea.vmem %s342_s7, 256  ;;  %p537_p11 = scmp.lt.s32.totalorder %s342_s7, %s342_s7 }
  0x3a   :  { %413 = vmatprep.subr.bf16.mxu1 %v565_v0  ;;  %393 = vmatprep.subr.bf16.mxu0 %v565_v0  ;;  %v447_v12 = vld [vmem:[#allocation9 + $0x30] sm:$0xff]   ;;  %v455_v13 = vld [vmem:[#allocation7 + $0x28] sm:$0xff]   ;;  %v449_v14 = vld [vmem:[#allocation9 + $0x38] sm:$0xff]   ;;  %p533_p10 = scmp.ne.s32.totalorder %s342_s7, %s532_s8  ;;  %p538_p12 = scmp.lt.s32.totalorder %s532_s8, %s532_s8 }
  0x3b   :  { %v451_v15 = vld [vmem:[#allocation4] sm:$0xff]   ;;  %v456_v16 = vld [vmem:[#allocation7 + $0x30] sm:$0xff]  }
  0x3c   :  { %v457_v17 = vld [vmem:[#allocation7 + $0x38] sm:$0xff]   ;;  %p539_p13 = por %p538_p12, %p537_p11 }
  0x3d   :  { %414 = vmatpush3.bf16.msra.mxu1 %v442_v2  ;;  %394 = vmatpush3.bf16.msra.mxu0 %v450_v5  ;;  %v355_v18 = vld [vmem:[%s674_s4] ss:$0 sm:$0xff] }
  0x3e   :  { %415 = vmatprep.subr.bf16.mxu1 %v565_v0  ;;  %395 = vmatprep.subr.bf16.mxu0 %v565_v0  ;;  %v354_v37 = vld [vmem:[%s673_s3] ss:$0 sm:$0xff]  ;;  %p540_p0 = pnand %p539_p13, %p533_p10 }
  0x41   :  { %416 = vmatpush3.bf16.msra.mxu1 %v443_v3  ;;  %396 = vmatpush3.bf16.msra.mxu0 %v452_v7 }
  0x42   :  { %417 = vmatprep.subr.bf16.mxu1 %v565_v0  ;;  %397 = vmatprep.subr.bf16.mxu0 %v565_v0 }
  0x45   :  { %418 = vmatpush3.bf16.msra.mxu1 %v444_v6  ;;  %398 = vmatpush3.bf16.msra.mxu0 %v453_v9 }
  0x46   :  { %419 = vmatprep.subr.bf16.mxu1 %v565_v0  ;;  %399 = vmatprep.subr.bf16.mxu0 %v565_v0 }
  0x49   :  { %420 = vmatpush3.bf16.msra.mxu1 %v445_v8  ;;  %400 = vmatpush3.bf16.msra.mxu0 %v454_v11 }
  0x4a   :  { %421 = vmatprep.subr.bf16.mxu1 %v565_v0  ;;  %401 = vmatprep.subr.bf16.mxu0 %v565_v0 }
  0x4d   :  { %422 = vmatpush3.bf16.msra.mxu1 %v446_v10  ;;  %402 = vmatpush3.bf16.msra.mxu0 %v455_v13 }
  0x4e   :  { %423 = vmatprep.subr.bf16.mxu1 %v565_v0  ;;  %403 = vmatprep.subr.bf16.mxu0 %v565_v0 }
  0x51   :  { %424 = vmatpush3.bf16.msra.mxu1 %v447_v12  ;;  %404 = vmatpush3.bf16.msra.mxu0 %v456_v16 }
  0x52   :  { %425 = vmatprep.subr.bf16.mxu1 %v565_v0  ;;  %405 = vmatprep.subr.bf16.mxu0 %v565_v0 }
  0x55   :  { %426 = vmatpush3.bf16.msra.mxu1 %v449_v14  ;;  %406 = vmatpush3.bf16.msra.mxu0 %v457_v17 }
  0x58   :  { %428 = vmatmul.mubr.bf16.vlgmr.msra.gmra.mrb[0].mxu1 %v451_v15  ;;  %408 = vmatmul.mubr.bf16.vlgmr.msra.gmra.mrb[0].mxu0 %v451_v15 }
 0x12b   :  { %v304_v19 = vpop.f32.mrb[0].mxu1  ;;  %v193_v29 = vpop.f32.mrb[0].mxu0 }
 0x12c   :  { %v311_v20 = vadd.f32 %v355_v18, %v304_v19  ;;  %v429_v21 = vpop.f32.mrb[1].mxu1  ;;  %v409_v30 = vpop.f32.mrb[1].mxu0  ;;  %v200_v38 = vadd.f32 %v354_v37, %v193_v29 }
 0x12d   :  { %v307_v22 = vpop.f32.mrb[2].mxu1  ;;  %v196_v31 = vpop.f32.mrb[2].mxu0 }
 0x12e   :  { %v320_v23 = vsub.f32 0.0, %v311_v20  ;;  %v312_v24 = vadd.f32 %v355_v18, %v307_v22  ;;  %v430_v25 = vpop.f32.mrb[3].mxu1  ;;  %v410_v32 = vpop.f32.mrb[3].mxu0  ;;  %v201_v41 = vadd.f32 %v354_v37, %v196_v31 }
 0x130   :  { %v322_v26 = vmul.f32 1.442695, %v320_v23  ;;  %v321_v27 = vsub.f32 0.0, %v312_v24 }
 0x132   :  { %458 = vpow2.f32 %v322_v26  ;;  %v324_v28 = vmul.f32 1.442695, %v321_v27 }
 0x134   :  { %460 = vpow2.f32 %v324_v28 }
 0x13c   :  { %v459_v33 = vpop.eup %458 }
 0x13d   :  { %v326_v34 = vadd.f32 1.0, %v459_v33 }
 0x13e   :  { %v461_v35 = vpop.eup %460 }
 0x13f   :  { %462 = vrcp.f32 %v326_v34  ;;  %v327_v36 = vadd.f32 1.0, %v461_v35 }
 0x141   :  { %464 = vrcp.f32 %v327_v36 }
 0x149   :  { %v463_v39 = vpop.eup %462 }
 0x14a   :  { %v332_v40 = vmul.f32 %v463_v39, %v200_v38 }
 0x14b   :  { %v465_v42 = vpop.eup %464 }
 0x14c   :  { %334 = vst [vmem:[#allocation10] sm:$0xff] %v332_v40  ;;  %v333_v43 = vmul.f32 %v465_v42, %v201_v41 }
 0x14e   :  { %335 = vst [vmem:[#allocation10 + $0x8] sm:$0xff] %v333_v43 }
 0x14f   :  { %543 = shalt.err (!%p540_p0)
}
 0x150   :  { %s544_s10 = scalar_lea.hbm %s675_s5, 256 }
 0x151   :  { %p545_p1 = scmp.ne.s32.totalorder %s675_s5, %s544_s10  ;;  %p548_p2 = scmp.lt.u32.totalorder %s544_s10, %s675_s5 }
 0x153   :  { %p550_p3 = pnand %p548_p2, %p545_p1 }
 0x155   :  { %553 = shalt.err (!%p550_p3)
}
 0x156   :  { %s568_s15 = smov 128   ;;  %s569_s16 = smov 8  }
 0x157   :  { %347 = dma.vmem_to_hbm [thread:$0]  %s342_s7, 256, %s675_s5, [#allocation6], %s568_s15, %s568_s15, %s569_s16  }
 0x158   :  { %558 = dma.done.wait [#allocation6], 256  }
 0x159   :  { %559 = vsyncadd [#allocation6], 4294967040 }
 0x15a   :  { %351 = vsyncpa [#allocation5], 1 }
 0x15b   :  { %352 = vsyncpa [#allocation8], 1 }
 0x15c   :  { %353 = vsyncpa [#allocation6], 1 }

</bundles_post_ra>
